<compile_context>
chip_gen: v5e
topology: v5e:2x2
jax: 0.10.0
libtpu: 0.0.40
codegen_flags: <defaults>
</compile_context>

<pallas_src>
import functools

import jax
import jax.numpy as jnp
from jax.experimental import pallas as pl
from jax.experimental.pallas import tpu as pltpu


def _osscos_kernel(p1_ref, p2_ref, p3_ref, loss_ref, *, inv_t):
    f32 = jnp.float32
    p1 = p1_ref[...]
    p2 = p2_ref[...]
    p3 = p3_ref[...]
    B = p1.shape[0]

    inv_t_f = f32(inv_t)
    inv_t_in = jnp.array(inv_t, dtype=p1.dtype)

    # Fold 1/T into the LHS operands once (O(B*D) instead of O(B^2) per block).
    p1s = p1 * inv_t_in
    p2s = p2 * inv_t_in
    p3s = p3 * inv_t_in

    def sim(lhs_scaled, rhs):
        # QK^T form: contract on the last (feature/lane) dims, f32 accumulate.
        return jax.lax.dot_general(
            lhs_scaled, rhs,
            dimension_numbers=(((1,), (1,)), ((), ())),
            preferred_element_type=f32)

    # 5 unique similarity blocks (s_11 is shared across both SimCLR terms).
    s_11 = sim(p1s, p1)
    s_12 = sim(p1s, p2)
    s_22 = sim(p2s, p2)
    s_13 = sim(p1s, p3)
    s_33 = sim(p3s, p3)

    p1f = p1.astype(f32)
    p2f = p2.astype(f32)
    p3f = p3.astype(f32)

    # Diagonals of the self-similarity blocks and the positive-pair logits,
    # from cheap O(B*D) VPU reductions (no (B,B) masking / gather needed).
    d_11 = jnp.sum(p1f * p1f, axis=-1, keepdims=True) * inv_t_f      # (B, 1)
    d_22 = jnp.sum(p2f * p2f, axis=-1, keepdims=True) * inv_t_f
    d_33 = jnp.sum(p3f * p3f, axis=-1, keepdims=True) * inv_t_f
    s_pos_12 = jnp.sum(p1f * p2f, axis=-1, keepdims=True) * inv_t_f  # (B, 1)
    s_pos_13 = jnp.sum(p1f * p3f, axis=-1, keepdims=True) * inv_t_f

    # Global max across all blocks: exact log-sum-exp shift, prevents exp
    # overflow while keeping every exp block shared/computed exactly once.
    m = jnp.maximum(
        jnp.maximum(jnp.max(s_11), jnp.max(s_12)),
        jnp.maximum(jnp.maximum(jnp.max(s_22), jnp.max(s_13)), jnp.max(s_33)))

    e_11 = jnp.exp(s_11 - m)
    e_12 = jnp.exp(s_12 - m)
    e_22 = jnp.exp(s_22 - m)
    e_13 = jnp.exp(s_13 - m)
    e_33 = jnp.exp(s_33 - m)

    # Shared term: row-sums of exp(s_11) with the diagonal removed.
    row_e11_nodiag = (jnp.sum(e_11, axis=-1, keepdims=True)
                      - jnp.exp(d_11 - m))                           # (B, 1)

    # Column sums via a tiny MXU contraction (== row sums of the dropped
    # e_ba block), keeping the result in the same (B, 1) sublane layout.
    ones_b1 = jnp.ones((B, 1), f32)

    def colsum(e):
        return jax.lax.dot_general(
            e, ones_b1,
            dimension_numbers=(((0,), (0,)), ((), ())),
            preferred_element_type=f32)                              # (B, 1)

    two_b = f32(2 * B)

    def pair_loss(e_1b, e_bb, d_bb, s_pos):
        # Rows 0..B-1 (the proj_1 half): drop the diag of the 11 block.
        denom_top = row_e11_nodiag + jnp.sum(e_1b, axis=-1, keepdims=True)
        # Rows B..2B-1 (the other half): colsum(e_1b) == rowsum(e_b1).
        denom_bot = (colsum(e_1b)
                     + jnp.sum(e_bb, axis=-1, keepdims=True)
                     - jnp.exp(d_bb - m))
        # -log(pos / denom) = log(denom) - s_pos,  denom = exp(m) * denom_shift
        total = (jnp.sum(jnp.log(denom_top)) + jnp.sum(jnp.log(denom_bot))
                 + two_b * m - 2.0 * jnp.sum(s_pos))
        return total / two_b

    loss = (pair_loss(e_12, e_22, d_22, s_pos_12)
            + pair_loss(e_13, e_33, d_33, s_pos_13))
    loss_ref[0, 0] = loss


def osscos_loss(proj_1, proj_2, proj_3, temperature):
    """OSSCoLoss.forward equivalent. proj_* : (B, D). Returns scalar f32."""
    B, D = proj_1.shape
    kernel = functools.partial(_osscos_kernel, inv_t=1.0 / float(temperature))

    # Size scoped VMEM to the actual buffers (double-buffered inputs + the
    # (B,B) f32 score/exp blocks), with generous headroom, capped at 64 MiB
    # (v7x physical VMEM per TensorCore).
    itemsize = jnp.dtype(proj_1.dtype).itemsize
    vmem_est = 2 * 3 * B * D * itemsize + 16 * B * B * 4
    vmem_limit = int(min(max(2 * vmem_est, 16 << 20), 64 << 20))

    # Advisory cost for XLA scheduling around the custom call.
    cost = pl.CostEstimate(
        flops=2 * 5 * B * B * D + 2 * 2 * B * B,      # 5 sim blocks + colsums
        transcendentals=5 * B * B + 7 * B,             # block exps + log/diag
        bytes_accessed=3 * B * D * itemsize + 4)

    out = pl.pallas_call(
        kernel,
        out_shape=jax.ShapeDtypeStruct((1, 1), jnp.float32),
        in_specs=[
            pl.BlockSpec((B, D), lambda: (0, 0)),
            pl.BlockSpec((B, D), lambda: (0, 0)),
            pl.BlockSpec((B, D), lambda: (0, 0)),
        ],
        out_specs=pl.BlockSpec(memory_space=pltpu.MemorySpace.SMEM),
        compiler_params=pltpu.CompilerParams(vmem_limit_bytes=vmem_limit),
        cost_estimate=cost,
    )(proj_1, proj_2, proj_3)
    return out[0, 0]


# ---------------- pure-JAX reference (mirrors the PyTorch code) ----------------
def _simclr_ref(p1, p2, temperature):
    B = p1.shape[0]
    out = jnp.concatenate([p1, p2], axis=0)
    sim = jnp.exp(out @ out.T / temperature)
    mask = 1.0 - jnp.eye(2 * B, dtype=sim.dtype)
    denom = jnp.sum(sim * mask, axis=-1)
    pos = jnp.exp(jnp.sum(p1 * p2, axis=-1) / temperature)
    pos = jnp.concatenate([pos, pos], axis=0)
    return jnp.mean(-jnp.log(pos / denom))


def _osscos_ref(p1, p2, p3, temperature):
    return _simclr_ref(p1, p2, temperature) + _simclr_ref(p1, p3, temperature)


if __name__ == "__main__":
    B, D = 8, 128
    temperature = 0.5

    key = jax.random.PRNGKey(0)
    k1, k2, k3 = jax.random.split(key, 3)
    p1 = jax.random.normal(k1, (B, D), dtype=jnp.float32)
    p2 = jax.random.normal(k2, (B, D), dtype=jnp.float32)
    p3 = jax.random.normal(k3, (B, D), dtype=jnp.float32)
    # L2-normalize rows (typical SimCLR usage; keeps exp() in a sane range).
    p1 = p1 / jnp.linalg.norm(p1, axis=-1, keepdims=True)
    p2 = p2 / jnp.linalg.norm(p2, axis=-1, keepdims=True)
    p3 = p3 / jnp.linalg.norm(p3, axis=-1, keepdims=True)

    loss = osscos_loss(p1, p2, p3, temperature)
    loss = jax.block_until_ready(loss)

    ref = jax.block_until_ready(_osscos_ref(p1, p2, p3, temperature))
    assert jnp.isfinite(loss), "kernel produced non-finite loss"
    assert jnp.allclose(loss, ref, rtol=1e-4, atol=1e-4), (loss, ref)

    print("KERNEL_OK")
</pallas_src>

<mosaic_0001>
module attributes {stable_mosaic.version = 11 : i64} {
  func.func @_osscos_kernel(%arg0: memref<8x128xf32, #tpu.memory_space<vmem>>, %arg1: memref<8x128xf32, #tpu.memory_space<vmem>>, %arg2: memref<8x128xf32, #tpu.memory_space<vmem>>, %arg3: memref<1x1xf32, #tpu.memory_space<smem>>) attributes {dimension_semantics = [], scalar_prefetch = 0 : i64, scratch_operands = 0 : i64, tpu.core_type = #tpu.core_type<tc>} {
    %c0 = arith.constant 0 : index
    %c0_0 = arith.constant 0 : index
    %0 = vector.load %arg0[%c0, %c0_0] : memref<8x128xf32, #tpu.memory_space<vmem>>, vector<8x128xf32>
    %c0_1 = arith.constant 0 : index
    %c0_2 = arith.constant 0 : index
    %1 = vector.load %arg1[%c0_1, %c0_2] : memref<8x128xf32, #tpu.memory_space<vmem>>, vector<8x128xf32>
    %c0_3 = arith.constant 0 : index
    %c0_4 = arith.constant 0 : index
    %2 = vector.load %arg2[%c0_3, %c0_4] : memref<8x128xf32, #tpu.memory_space<vmem>>, vector<8x128xf32>
    %cst = arith.constant 2.000000e+00 : f32
    %3 = vector.broadcast %cst : f32 to vector<8x128xf32>
    %4 = arith.mulf %0, %3 : vector<8x128xf32>
    %cst_5 = arith.constant 2.000000e+00 : f32
    %5 = vector.broadcast %cst_5 : f32 to vector<8x128xf32>
    %6 = arith.mulf %1, %5 : vector<8x128xf32>
    %cst_6 = arith.constant 2.000000e+00 : f32
    %7 = vector.broadcast %cst_6 : f32 to vector<8x128xf32>
    %8 = arith.mulf %2, %7 : vector<8x128xf32>
    %cst_7 = arith.constant dense<0.000000e+00> : vector<8x8xf32>
    %9 = tpu.matmul %4, %0, %cst_7 {dimension_numbers = #tpu.dot_dimension_numbers<[1], [1], [0], [0], [0, 0, 1, 0], [], []>} : vector<8x128xf32>, vector<8x128xf32>, vector<8x8xf32> -> vector<8x8xf32>
    %cst_8 = arith.constant dense<0.000000e+00> : vector<8x8xf32>
    %10 = tpu.matmul %4, %1, %cst_8 {dimension_numbers = #tpu.dot_dimension_numbers<[1], [1], [0], [0], [0, 0, 1, 0], [], []>} : vector<8x128xf32>, vector<8x128xf32>, vector<8x8xf32> -> vector<8x8xf32>
    %cst_9 = arith.constant dense<0.000000e+00> : vector<8x8xf32>
    %11 = tpu.matmul %6, %1, %cst_9 {dimension_numbers = #tpu.dot_dimension_numbers<[1], [1], [0], [0], [0, 0, 1, 0], [], []>} : vector<8x128xf32>, vector<8x128xf32>, vector<8x8xf32> -> vector<8x8xf32>
    %cst_10 = arith.constant dense<0.000000e+00> : vector<8x8xf32>
    %12 = tpu.matmul %4, %2, %cst_10 {dimension_numbers = #tpu.dot_dimension_numbers<[1], [1], [0], [0], [0, 0, 1, 0], [], []>} : vector<8x128xf32>, vector<8x128xf32>, vector<8x8xf32> -> vector<8x8xf32>
    %cst_11 = arith.constant dense<0.000000e+00> : vector<8x8xf32>
    %13 = tpu.matmul %8, %2, %cst_11 {dimension_numbers = #tpu.dot_dimension_numbers<[1], [1], [0], [0], [0, 0, 1, 0], [], []>} : vector<8x128xf32>, vector<8x128xf32>, vector<8x8xf32> -> vector<8x8xf32>
    %14 = arith.mulf %0, %0 : vector<8x128xf32>
    %cst_12 = arith.constant dense<0.000000e+00> : vector<8xf32>
    %15 = vector.multi_reduction <add>, %14, %cst_12 [1] : vector<8x128xf32> to vector<8xf32>
    %16 = vector.shape_cast %15 : vector<8xf32> to vector<8x1xf32>
    %cst_13 = arith.constant 2.000000e+00 : f32
    %17 = vector.broadcast %cst_13 : f32 to vector<8x1xf32>
    %18 = arith.mulf %16, %17 : vector<8x1xf32>
    %19 = arith.mulf %1, %1 : vector<8x128xf32>
    %cst_14 = arith.constant dense<0.000000e+00> : vector<8xf32>
    %20 = vector.multi_reduction <add>, %19, %cst_14 [1] : vector<8x128xf32> to vector<8xf32>
    %21 = vector.shape_cast %20 : vector<8xf32> to vector<8x1xf32>
    %cst_15 = arith.constant 2.000000e+00 : f32
    %22 = vector.broadcast %cst_15 : f32 to vector<8x1xf32>
    %23 = arith.mulf %21, %22 : vector<8x1xf32>
    %24 = arith.mulf %2, %2 : vector<8x128xf32>
    %cst_16 = arith.constant dense<0.000000e+00> : vector<8xf32>
    %25 = vector.multi_reduction <add>, %24, %cst_16 [1] : vector<8x128xf32> to vector<8xf32>
    %26 = vector.shape_cast %25 : vector<8xf32> to vector<8x1xf32>
    %cst_17 = arith.constant 2.000000e+00 : f32
    %27 = vector.broadcast %cst_17 : f32 to vector<8x1xf32>
    %28 = arith.mulf %26, %27 : vector<8x1xf32>
    %29 = arith.mulf %0, %1 : vector<8x128xf32>
    %cst_18 = arith.constant dense<0.000000e+00> : vector<8xf32>
    %30 = vector.multi_reduction <add>, %29, %cst_18 [1] : vector<8x128xf32> to vector<8xf32>
    %31 = vector.shape_cast %30 : vector<8xf32> to vector<8x1xf32>
    %cst_19 = arith.constant 2.000000e+00 : f32
    %32 = vector.broadcast %cst_19 : f32 to vector<8x1xf32>
    %33 = arith.mulf %31, %32 : vector<8x1xf32>
    %34 = arith.mulf %0, %2 : vector<8x128xf32>
    %cst_20 = arith.constant dense<0.000000e+00> : vector<8xf32>
    %35 = vector.multi_reduction <add>, %34, %cst_20 [1] : vector<8x128xf32> to vector<8xf32>
    %36 = vector.shape_cast %35 : vector<8xf32> to vector<8x1xf32>
    %cst_21 = arith.constant 2.000000e+00 : f32
    %37 = vector.broadcast %cst_21 : f32 to vector<8x1xf32>
    %38 = arith.mulf %36, %37 : vector<8x1xf32>
    %39 = vector.shape_cast %9 : vector<8x8xf32> to vector<1x8x8xf32>
    %cst_22 = arith.constant dense<0xFF800000> : vector<1xf32>
    %40 = vector.multi_reduction <maximumf>, %39, %cst_22 [1, 2] : vector<1x8x8xf32> to vector<1xf32>
    %41 = vector.shape_cast %40 : vector<1xf32> to vector<1x1x1xf32>
    %42 = vector.extract %41[0, 0, 0] : f32 from vector<1x1x1xf32>
    %43 = vector.shape_cast %10 : vector<8x8xf32> to vector<1x8x8xf32>
    %cst_23 = arith.constant dense<0xFF800000> : vector<1xf32>
    %44 = vector.multi_reduction <maximumf>, %43, %cst_23 [1, 2] : vector<1x8x8xf32> to vector<1xf32>
    %45 = vector.shape_cast %44 : vector<1xf32> to vector<1x1x1xf32>
    %46 = vector.extract %45[0, 0, 0] : f32 from vector<1x1x1xf32>
    %47 = arith.maximumf %42, %46 : f32
    %48 = vector.shape_cast %11 : vector<8x8xf32> to vector<1x8x8xf32>
    %cst_24 = arith.constant dense<0xFF800000> : vector<1xf32>
    %49 = vector.multi_reduction <maximumf>, %48, %cst_24 [1, 2] : vector<1x8x8xf32> to vector<1xf32>
    %50 = vector.shape_cast %49 : vector<1xf32> to vector<1x1x1xf32>
    %51 = vector.extract %50[0, 0, 0] : f32 from vector<1x1x1xf32>
    %52 = vector.shape_cast %12 : vector<8x8xf32> to vector<1x8x8xf32>
    %cst_25 = arith.constant dense<0xFF800000> : vector<1xf32>
    %53 = vector.multi_reduction <maximumf>, %52, %cst_25 [1, 2] : vector<1x8x8xf32> to vector<1xf32>
    %54 = vector.shape_cast %53 : vector<1xf32> to vector<1x1x1xf32>
    %55 = vector.extract %54[0, 0, 0] : f32 from vector<1x1x1xf32>
    %56 = arith.maximumf %51, %55 : f32
    %57 = vector.shape_cast %13 : vector<8x8xf32> to vector<1x8x8xf32>
    %cst_26 = arith.constant dense<0xFF800000> : vector<1xf32>
    %58 = vector.multi_reduction <maximumf>, %57, %cst_26 [1, 2] : vector<1x8x8xf32> to vector<1xf32>
    %59 = vector.shape_cast %58 : vector<1xf32> to vector<1x1x1xf32>
    %60 = vector.extract %59[0, 0, 0] : f32 from vector<1x1x1xf32>
    %61 = arith.maximumf %56, %60 : f32
    %62 = arith.maximumf %47, %61 : f32
    %63 = vector.broadcast %62 : f32 to vector<8x8xf32>
    %64 = arith.subf %9, %63 : vector<8x8xf32>
    %65 = math.exp %64 : vector<8x8xf32>
    %66 = vector.broadcast %62 : f32 to vector<8x8xf32>
    %67 = arith.subf %10, %66 : vector<8x8xf32>
    %68 = math.exp %67 : vector<8x8xf32>
    %69 = vector.broadcast %62 : f32 to vector<8x8xf32>
    %70 = arith.subf %11, %69 : vector<8x8xf32>
    %71 = math.exp %70 : vector<8x8xf32>
    %72 = vector.broadcast %62 : f32 to vector<8x8xf32>
    %73 = arith.subf %12, %72 : vector<8x8xf32>
    %74 = math.exp %73 : vector<8x8xf32>
    %75 = vector.broadcast %62 : f32 to vector<8x8xf32>
    %76 = arith.subf %13, %75 : vector<8x8xf32>
    %77 = math.exp %76 : vector<8x8xf32>
    %cst_27 = arith.constant dense<0.000000e+00> : vector<8xf32>
    %78 = vector.multi_reduction <add>, %65, %cst_27 [1] : vector<8x8xf32> to vector<8xf32>
    %79 = vector.shape_cast %78 : vector<8xf32> to vector<8x1xf32>
    %80 = vector.broadcast %62 : f32 to vector<8x1xf32>
    %81 = arith.subf %18, %80 : vector<8x1xf32>
    %82 = math.exp %81 : vector<8x1xf32>
    %83 = arith.subf %79, %82 : vector<8x1xf32>
    %cst_28 = arith.constant 1.000000e+00 : f32
    %84 = vector.broadcast %cst_28 : f32 to vector<8x1xf32>
    %cst_29 = arith.constant dense<0.000000e+00> : vector<8xf32>
    %85 = vector.multi_reduction <add>, %68, %cst_29 [1] : vector<8x8xf32> to vector<8xf32>
    %86 = vector.shape_cast %85 : vector<8xf32> to vector<8x1xf32>
    %87 = arith.addf %83, %86 : vector<8x1xf32>
    %cst_30 = arith.constant dense<0.000000e+00> : vector<8x1xf32>
    %88 = tpu.matmul %68, %84, %cst_30 {dimension_numbers = #tpu.dot_dimension_numbers<[0], [0], [1], [1], [0, 1, 1, 1], [], []>} : vector<8x8xf32>, vector<8x1xf32>, vector<8x1xf32> -> vector<8x1xf32>
    %cst_31 = arith.constant dense<0.000000e+00> : vector<8xf32>
    %89 = vector.multi_reduction <add>, %71, %cst_31 [1] : vector<8x8xf32> to vector<8xf32>
    %90 = vector.shape_cast %89 : vector<8xf32> to vector<8x1xf32>
    %91 = arith.addf %88, %90 : vector<8x1xf32>
    %92 = vector.broadcast %62 : f32 to vector<8x1xf32>
    %93 = arith.subf %23, %92 : vector<8x1xf32>
    %94 = math.exp %93 : vector<8x1xf32>
    %95 = arith.subf %91, %94 : vector<8x1xf32>
    %96 = math.log %87 : vector<8x1xf32>
    %97 = vector.shape_cast %96 : vector<8x1xf32> to vector<1x8x1xf32>
    %cst_32 = arith.constant dense<0.000000e+00> : vector<1xf32>
    %98 = vector.multi_reduction <add>, %97, %cst_32 [1, 2] : vector<1x8x1xf32> to vector<1xf32>
    %99 = vector.shape_cast %98 : vector<1xf32> to vector<1x1x1xf32>
    %100 = vector.extract %99[0, 0, 0] : f32 from vector<1x1x1xf32>
    %101 = math.log %95 : vector<8x1xf32>
    %102 = vector.shape_cast %101 : vector<8x1xf32> to vector<1x8x1xf32>
    %cst_33 = arith.constant dense<0.000000e+00> : vector<1xf32>
    %103 = vector.multi_reduction <add>, %102, %cst_33 [1, 2] : vector<1x8x1xf32> to vector<1xf32>
    %104 = vector.shape_cast %103 : vector<1xf32> to vector<1x1x1xf32>
    %105 = vector.extract %104[0, 0, 0] : f32 from vector<1x1x1xf32>
    %106 = arith.addf %100, %105 : f32
    %cst_34 = arith.constant 1.600000e+01 : f32
    %107 = arith.mulf %cst_34, %62 : f32
    %108 = arith.addf %106, %107 : f32
    %109 = vector.shape_cast %33 : vector<8x1xf32> to vector<1x8x1xf32>
    %cst_35 = arith.constant dense<0.000000e+00> : vector<1xf32>
    %110 = vector.multi_reduction <add>, %109, %cst_35 [1, 2] : vector<1x8x1xf32> to vector<1xf32>
    %111 = vector.shape_cast %110 : vector<1xf32> to vector<1x1x1xf32>
    %112 = vector.extract %111[0, 0, 0] : f32 from vector<1x1x1xf32>
    %cst_36 = arith.constant 2.000000e+00 : f32
    %113 = arith.mulf %cst_36, %112 : f32
    %114 = arith.subf %108, %113 : f32
    %cst_37 = arith.constant 1.600000e+01 : f32
    %115 = arith.divf %114, %cst_37 : f32
    %cst_38 = arith.constant dense<0.000000e+00> : vector<8xf32>
    %116 = vector.multi_reduction <add>, %74, %cst_38 [1] : vector<8x8xf32> to vector<8xf32>
    %117 = vector.shape_cast %116 : vector<8xf32> to vector<8x1xf32>
    %118 = arith.addf %83, %117 : vector<8x1xf32>
    %cst_39 = arith.constant dense<0.000000e+00> : vector<8x1xf32>
    %119 = tpu.matmul %74, %84, %cst_39 {dimension_numbers = #tpu.dot_dimension_numbers<[0], [0], [1], [1], [0, 1, 1, 1], [], []>} : vector<8x8xf32>, vector<8x1xf32>, vector<8x1xf32> -> vector<8x1xf32>
    %cst_40 = arith.constant dense<0.000000e+00> : vector<8xf32>
    %120 = vector.multi_reduction <add>, %77, %cst_40 [1] : vector<8x8xf32> to vector<8xf32>
    %121 = vector.shape_cast %120 : vector<8xf32> to vector<8x1xf32>
    %122 = arith.addf %119, %121 : vector<8x1xf32>
    %123 = vector.broadcast %62 : f32 to vector<8x1xf32>
    %124 = arith.subf %28, %123 : vector<8x1xf32>
    %125 = math.exp %124 : vector<8x1xf32>
    %126 = arith.subf %122, %125 : vector<8x1xf32>
    %127 = math.log %118 : vector<8x1xf32>
    %128 = vector.shape_cast %127 : vector<8x1xf32> to vector<1x8x1xf32>
    %cst_41 = arith.constant dense<0.000000e+00> : vector<1xf32>
    %129 = vector.multi_reduction <add>, %128, %cst_41 [1, 2] : vector<1x8x1xf32> to vector<1xf32>
    %130 = vector.shape_cast %129 : vector<1xf32> to vector<1x1x1xf32>
    %131 = vector.extract %130[0, 0, 0] : f32 from vector<1x1x1xf32>
    %132 = math.log %126 : vector<8x1xf32>
    %133 = vector.shape_cast %132 : vector<8x1xf32> to vector<1x8x1xf32>
    %cst_42 = arith.constant dense<0.000000e+00> : vector<1xf32>
    %134 = vector.multi_reduction <add>, %133, %cst_42 [1, 2] : vector<1x8x1xf32> to vector<1xf32>
    %135 = vector.shape_cast %134 : vector<1xf32> to vector<1x1x1xf32>
    %136 = vector.extract %135[0, 0, 0] : f32 from vector<1x1x1xf32>
    %137 = arith.addf %131, %136 : f32
    %cst_43 = arith.constant 1.600000e+01 : f32
    %138 = arith.mulf %cst_43, %62 : f32
    %139 = arith.addf %137, %138 : f32
    %140 = vector.shape_cast %38 : vector<8x1xf32> to vector<1x8x1xf32>
    %cst_44 = arith.constant dense<0.000000e+00> : vector<1xf32>
    %141 = vector.multi_reduction <add>, %140, %cst_44 [1, 2] : vector<1x8x1xf32> to vector<1xf32>
    %142 = vector.shape_cast %141 : vector<1xf32> to vector<1x1x1xf32>
    %143 = vector.extract %142[0, 0, 0] : f32 from vector<1x1x1xf32>
    %cst_45 = arith.constant 2.000000e+00 : f32
    %144 = arith.mulf %cst_45, %143 : f32
    %145 = arith.subf %139, %144 : f32
    %cst_46 = arith.constant 1.600000e+01 : f32
    %146 = arith.divf %145, %cst_46 : f32
    %147 = arith.addf %115, %146 : f32
    %c0_47 = arith.constant 0 : index
    %c0_48 = arith.constant 0 : index
    %148 = memref.load %arg3[%c0_47, %c0_48] : memref<1x1xf32, #tpu.memory_space<smem>>
    memref.store %147, %arg3[%c0_47, %c0_48] : memref<1x1xf32, #tpu.memory_space<smem>>
    return
  }
}

</mosaic_0001>

<bundles_post_ra>
// kernel: tpu_custom_call.1
= control target key start
LH: loop header
LB: loop body
LE: loop exit
PB: predicated region body
PF: predicated region fallthrough
CT: control target
= control target key end

     0   :  { %8 = vsyncpa [#allocation3], 0  ;;  %s777_s0 = inlined_call_operand.hbm [shape: f32[8,128], index: 0, kind: input, shape index: {}]   ;;  %s778_s1 = inlined_call_operand.hbm [shape: f32[8,128], index: 1, kind: input, shape index: {}]   ;;  %s779_s2 = inlined_call_operand.hbm [shape: f32[8,128], index: 2, kind: input, shape index: {}]   ;;  %s780_s3 = inlined_call_operand.hbm [shape: f32[1,1], index: 3, kind: output, shape index: {}]  }
   0x1   :  { %9 = vsyncpa [#allocation6], 0  ;;  %s27_s14 = sshll.u32 %s778_s1, 4  ;;  %s28_s14 = int_to_ptr.hbm [resolvable:$true] %s27_s14 }
   0x2   :  { %10 = vsyncpa [#allocation4], 0  ;;  %s657_s15 = smov [#allocation5]   ;;  %s16_s19 = sshll.u32 %s777_s0, 4  ;;  %s17_s19 = int_to_ptr.hbm [resolvable:$true] %s16_s19 }
   0x3   :  { %s29_s16 = sshll.u32 %s657_s15, 4  ;;  %s658_s20 = smov [#allocation2]   ;;  %s30_s16 = int_to_ptr.vmem [resolvable:$true] %s29_s16 }
   0x4   :  { %32 = dma.hbm_to_vmem [thread:$0]  %s28_s14, 128, %s30_s16, [#allocation6]  }
   0x5   :  { %s18_s21 = sshll.u32 %s658_s20, 4  ;;  %s38_s24 = sshll.u32 %s779_s2, 4  ;;  %s19_s21 = int_to_ptr.vmem [resolvable:$true] %s18_s21  ;;  %s39_s24 = int_to_ptr.hbm [resolvable:$true] %s38_s24 }
   0x6   :  { %21 = dma.hbm_to_vmem [thread:$0]  %s17_s19, 128, %s19_s21, [#allocation3]  }
   0x7   :  { %s659_s1 = smov [#allocation7]  }
   0x8   :  { %s40_s25 = sshll.u32 %s659_s1, 4  ;;  %s41_s25 = int_to_ptr.vmem [resolvable:$true] %s40_s25 }
   0x9   :  { %43 = dma.hbm_to_vmem [thread:$0]  %s39_s24, 128, %s41_s25, [#allocation6]  }
   0xa   :  { %651 = dma.done.wait [#allocation3], 128  }
   0xb   :  { %652 = vsyncadd [#allocation3], 4294967168 }
   0xc   :  { %653 = dma.done.wait [#allocation6], 256  }
   0xd   :  { %654 = vsyncadd [#allocation6], 4294967040  ;;  %v692_v0 = vld [vmem:[#allocation2] sm:$0xff]  ;;  %v694_v1 = vld [vmem:[#allocation5] sm:$0xff]  ;;  %vm182_vm0 = vcmask 64512   ;;  %vm328_vm1 = vcmask 7168  }
   0xe   :  { %v696_v2 = vld [vmem:[#allocation7] sm:$0xff]  ;;  %77 = vmatpush.xpose.msra.mxu0 %v692_v0  ;;  %117 = vmatpush.xpose.msra.mxu2 %v694_v1  ;;  %v59_v3 = vmul.f32 2.0, %v692_v0  ;;  %v60_v4 = vmul.f32 2.0, %v694_v1  ;;  %v162_v16 = vmul.f32 %v692_v0, %v692_v0  ;;  %v166_v17 = vmul.f32 %v694_v1, %v694_v1  ;;  %s496_s1 = sshll.u32 %s780_s3, 4  ;;  %s497_s1 = int_to_ptr.hbm [resolvable:$true] %s496_s1 }
   0xf   :  { %97 = vmatpush.xpose.msra.mxu1 %v694_v1  ;;  %137 = vmatpush.xpose.msra.mxu3 %v696_v2  ;;  %v61_v5 = vmul.f32 2.0, %v696_v2  ;;  %v170_v18 = vmul.f32 %v696_v2, %v696_v2 }
  0x11   :  { %78 = vmatmul.f32.vlgmr.msra.gmra.mxu0 %v59_v3  ;;  %118 = vmatmul.f32.vlgmr.msra.gmra.mxu2 %v60_v4 }
  0x12   :  { %157 = vmatpush.xpose.msrb.mxu0 %v696_v2  ;;  %98 = vmatmul.f32.vlgmr.msra.gmra.mxu1 %v59_v3 }
  0x13   :  { %138 = vmatmul.f32.vlgmr.msra.gmra.mxu3 %v59_v3 }
  0x19   :  { %158 = vmatmul.f32.vlgmr.msrb.gmra.mxu0 %v61_v5 }
  0x8e   :  { %v706_v6 = vpop.f32.mrf.mxu0 }
  0x8f   :  { %v183_v7 = vsel %vm182_vm0, %v706_v6, -inf  ;;  %v710_v8 = vpop.f32.mrf.mxu1 }
  0x90   :  { %184 = vmax.xlane.f32.xlu0 %v183_v7  ;;  %v193_v11 = vsel %vm182_vm0, %v710_v8, -inf }
  0x94   :  { %v712_v9 = vpop.f32.mrf.mxu2 }
  0x95   :  { %v204_v10 = vsel %vm182_vm0, %v712_v9, -inf }
  0x96   :  { %205 = vmax.xlane.f32.xlu1 %v204_v10  ;;  %v718_v12 = vpop.f32.mrf.mxu0  ;;  %v722_v14 = vpop.f32.mrf.mxu3 }
  0x97   :  { %v225_v13 = vsel %vm182_vm0, %v718_v12, -inf  ;;  %v214_v15 = vsel %vm182_vm0, %v722_v14, -inf }
  0x98   :  { %194 = vmax.xlane.f32.xlu0 %v193_v11  ;;  %226 = vmax.xlane.f32.xlu2 %v225_v13 }
  0x9e   :  { %215 = vmax.xlane.f32.xlu1 %v214_v15 }
  0xa6   :  { %163 = vadd.xlane.f32.xlu1 %v162_v16 }
  0xae   :  { %167 = vadd.xlane.f32.xlu1 %v166_v17  ;;  %v178_v17 = vmul.f32 %v696_v2, %v692_v0 }
  0xb6   :  { %171 = vadd.xlane.f32.xlu1 %v170_v18 }
 0x103   :  { %v185_v19 = vpop.xlane.xlu0 %184 }
 0x104   :  { %v186_v20 = vrot.slane %v185_v19, 4 }
 0x106   :  { %v187_v21 = vmax.f32 %v185_v19, %v186_v20 }
 0x108   :  { %v188_v22 = vrot.slane %v187_v21, 2 }
 0x109   :  { %v206_v23 = vpop.xlane.xlu1 %205 }
 0x10a   :  { %v207_v24 = vrot.slane %v206_v23, 4  ;;  %v189_v25 = vmax.f32 %v187_v21, %v188_v22 }
 0x10b   :  { %v195_v26 = vpop.xlane.xlu0 %194  ;;  %v227_v27 = vpop.xlane.xlu2 %226 }
 0x10c   :  { %v208_v28 = vmax.f32 %v206_v23, %v207_v24  ;;  %v196_v29 = vrot.slane %v195_v26, 4  ;;  %v228_v30 = vrot.slane %v227_v27, 4  ;;  %v190_v31 = vrot.slane %v189_v25, 1 }
 0x10e   :  { %v209_v32 = vrot.slane %v208_v28, 2  ;;  %v197_v33 = vmax.f32 %v195_v26, %v196_v29  ;;  %v229_v34 = vmax.f32 %v227_v27, %v228_v30  ;;  %v191_v35 = vmax.f32 %v189_v25, %v190_v31 }
 0x110   :  { %v198_v36 = vrot.slane %v197_v33, 2  ;;  %510 = vpush %v191_v35  ;;  %v210_v37 = vmax.f32 %v208_v28, %v209_v32  ;;  %v230_v38 = vrot.slane %v229_v34, 2 }
 0x111   :  { %v216_v39 = vpop.xlane.xlu1 %215 }
 0x112   :  { %v217_v40 = vrot.slane %v216_v39, 4  ;;  %v199_v41 = vmax.f32 %v197_v33, %v198_v36  ;;  %v211_v42 = vrot.slane %v210_v37, 1  ;;  %v231_v45 = vmax.f32 %v229_v34, %v230_v38 }
 0x114   :  { %v218_v43 = vmax.f32 %v216_v39, %v217_v40  ;;  %v200_v44 = vrot.slane %v199_v41, 1  ;;  %v212_v48 = vmax.f32 %v210_v37, %v211_v42  ;;  %v232_v50 = vrot.slane %v231_v45, 1 }
 0x116   :  { %v219_v46 = vrot.slane %v218_v43, 2  ;;  %v201_v47 = vmax.f32 %v199_v41, %v200_v44  ;;  %v233_v53 = vmax.f32 %v231_v45, %v232_v50 }
 0x118   :  { %512 = vpush %v201_v47  ;;  %v220_v49 = vmax.f32 %v218_v43, %v219_v46 }
 0x119   :  { %514 = vpush %v212_v48  ;;  %v164_v54 = vpop.xlane.xlu1 %163 }
 0x11a   :  { %v221_v51 = vrot.slane %v220_v49, 1  ;;  %v165_v22 = vmul.f32 2.0, %v164_v54 }
 0x11c   :  { %v222_v52 = vmax.f32 %v220_v49, %v221_v51 }
 0x11e   :  { %516 = vpush %v222_v52 }
 0x11f   :  { %518 = vpush %v233_v53 }
 0x121   :  { %v168_v55 = vpop.xlane.xlu1 %167 }
 0x122   :  { %v732_v56 = vmul.f32 2.0, %v168_v55 }
 0x129   :  { %v172_v19 = vpop.xlane.xlu1 %171 }
 0x12a   :  { %v173_v48 = vmul.f32 2.0, %v172_v19 }
 0x141   :  { %s511_s0 = spop %510 }
 0x149   :  { %s513_s2 = spop %512 }
 0x14a   :  { %s515_s26 = spop %514  ;;  %s203_s30 = smax.f32 %s513_s2, %s511_s0 }
 0x14b   :  { %s662_s2 = smov [#allocation8]  }
 0x14f   :  { %s517_s27 = spop %516 }
 0x150   :  { %s224_s28 = smax.f32 %s517_s27, %s515_s26  ;;  %s519_s29 = spop %518 }
 0x151   :  { %s235_s4 = smax.f32 %s519_s29, %s224_s28 }
 0x152   :  { %s734_s5 = smax.f32 %s235_s4, %s203_s30 }
 0x153   :  { %v737_v57 = vstv %s734_s5  ;;  %s352_s12 = smul.f32 16.0, %s734_s5 }
 0x154   :  { %v247_v58 = vsub.f32 %v722_v14, %v737_v57  ;;  %v241_v59 = vsub.f32 %v710_v8, %v737_v57  ;;  %v238_v60 = vsub.f32 %v706_v6, %v737_v57  ;;  %v322_v61 = vsub.f32 %v732_v56, %v737_v57 }
 0x155   :  { %v244_v4 = vsub.f32 %v712_v9, %v737_v57  ;;  %v174_v9 = vmul.f32 %v694_v1, %v692_v0  ;;  %v250_v15 = vsub.f32 %v718_v12, %v737_v57  ;;  %v256_v23 = vsub.f32 %v165_v22, %v737_v57 }
 0x156   :  { %v248_v62 = vmul.f32 1.442695, %v247_v58  ;;  %v242_v63 = vmul.f32 1.442695, %v241_v59  ;;  %v239_v3 = vmul.f32 1.442695, %v238_v60  ;;  %v437_v51 = vsub.f32 %v173_v48, %v737_v57 }
 0x157   :  { %v245_v5 = vmul.f32 1.442695, %v244_v4  ;;  %v251_v16 = vmul.f32 1.442695, %v250_v15  ;;  %v257_v24 = vmul.f32 1.442695, %v256_v23 }
 0x158   :  { %541 = vpow2.f32 %v248_v62  ;;  %v660_v12 = vmov 1.0   ;;  %v323_v52 = vmul.f32 1.442695, %v322_v61  ;;  %v438_v53 = vmul.f32 1.442695, %v437_v51 }
 0x159   :  { %543 = vpow2.f32 %v242_v63  ;;  %432 = vmatpush.msrb.mxu2 %v660_v12  ;;  %317 = vmatpush.msrb.mxu1 %v660_v12 }
 0x15a   :  { %545 = vpow2.f32 %v239_v3 }
 0x15b   :  { %547 = vpow2.f32 %v245_v5 }
 0x15c   :  { %549 = vpow2.f32 %v251_v16 }
 0x15d   :  { %551 = vpow2.f32 %v257_v24 }
 0x15e   :  { %v542_v7 = vpop.eup %541 }
 0x15f   :  { %v544_v10 = vpop.eup %543  ;;  %382 = vxpose.xlu2.b32.start.end [1/1] (short) (narrow) %v542_v7, 8  ;;  %v375_v21 = vsel %vm182_vm0, %v542_v7, 0.0 }
 0x160   :  { %v546_v8 = vpop.eup %545  ;;  %267 = vxpose.xlu0.b32.start.end [1/1] (short) (narrow) %v544_v10, 8  ;;  %v260_v14 = vsel %vm182_vm0, %v544_v10, 0.0 }
 0x161   :  { %v253_v6 = vsel %vm182_vm0, %v546_v8, 0.0  ;;  %v548_v11 = vpop.eup %547 }
 0x162   :  { %254 = vadd.xlane.f32.xlu1 %v253_v6  ;;  %v264_v13 = vsel %vm182_vm0, %v548_v11, 0.0  ;;  %v550_v18 = vpop.eup %549  ;;  %v661_v11 = vmov 16.0  }
 0x163   :  { %v379_v20 = vsel %vm182_vm0, %v550_v18, 0.0  ;;  %v552_v0 = vpop.eup %551 }
 0x16a   :  { %265 = vadd.xlane.f32.xlu1 %v264_v13 }
 0x172   :  { %261 = vadd.xlane.f32.xlu1 %v260_v14 }
 0x17a   :  { %175 = vadd.xlane.f32.xlu1 %v174_v9 }
 0x182   :  { %179 = vadd.xlane.f32.xlu1 %v178_v17 }
 0x1d0   :  { %380 = vadd.xlane.f32.xlu2 %v379_v20 }
 0x1d1   :  { %376 = vadd.xlane.f32.xlu0 %v375_v21 }
 0x1d5   :  { %v255_v1 = vpop.xlane.xlu1 %254 }
 0x1d6   :  { %v259_v2 = vsub.f32 %v255_v1, %v552_v0 }
 0x1dd   :  { %v266_v25 = vpop.xlane.xlu1 %265 }
 0x1e5   :  { %v262_v26 = vpop.xlane.xlu1 %261 }
 0x1e6   :  { %v263_v27 = vadd.f32 %v262_v26, %v259_v2 }
 0x1e8   :  { %553 = vlog2.f32 %v263_v27 }
 0x1ed   :  { %v176_v28 = vpop.xlane.xlu1 %175 }
 0x1ee   :  { %v177_v29 = vmul.f32 2.0, %v176_v28  ;;  %v554_v31 = vpop.eup %553 }
 0x1ef   :  { %v327_v32 = vmul.f32 0.6931472, %v554_v31 }
 0x1f0   :  { %v354_v30 = vsel %vm328_vm1, %v177_v29, 0.0 }
 0x1f1   :  { %355 = vadd.xlane.f32.xlu1 %v354_v30  ;;  %v329_v33 = vsel %vm328_vm1, %v327_v32, 0.0 }
 0x1f5   :  { %v180_v41 = vpop.xlane.xlu1 %179 }
 0x1f6   :  { %v181_v8 = vmul.f32 2.0, %v180_v41 }
 0x1f8   :  { %v398_v34 = vpop.trf.xlu2  ;;  %v467_v6 = vsel %vm328_vm1, %v181_v8, 0.0 }
 0x1f9   :  { %330 = vadd.xlane.f32.xlu1 %v329_v33  ;;  %509 = vmatmul.msk.f32.vlgmr.msrb.gmra.mxu2 %vm182_vm0, %v398_v34 }
 0x204   :  { %v283_v35 = vpop.trf.xlu0 }
 0x205   :  { %508 = vmatmul.msk.f32.vlgmr.msrb.gmra.mxu1 %vm182_vm0, %v283_v35 }
 0x243   :  { %v381_v55 = vpop.xlane.xlu2 %380 }
 0x244   :  { %v377_v36 = vpop.xlane.xlu0 %376 }
 0x245   :  { %v378_v37 = vadd.f32 %v377_v36, %v259_v2 }
 0x247   :  { %555 = vlog2.f32 %v378_v37 }
 0x248   :  { %557 = vpow2.f32 %v323_v52 }
 0x249   :  { %559 = vpow2.f32 %v438_v53 }
 0x24d   :  { %v556_v38 = vpop.eup %555 }
 0x24e   :  { %v442_v39 = vmul.f32 0.6931472, %v556_v38  ;;  %v558_v62 = vpop.eup %557 }
 0x24f   :  { %v560_v3 = vpop.eup %559 }
 0x250   :  { %v443_v40 = vsel %vm328_vm1, %v442_v39, 0.0 }
 0x251   :  { %444 = vadd.xlane.f32.xlu1 %v443_v40 }
 0x264   :  { %v356_v42 = vpop.xlane.xlu1 %355 }
 0x265   :  { %v357_v14 = vrot.slane %v356_v42, 4 }
 0x267   :  { %v358_v16 = vadd.f32 %v357_v14, %v356_v42 }
 0x269   :  { %v359_v19 = vrot.slane %v358_v16, 2 }
 0x26b   :  { %v360_v24 = vadd.f32 %v359_v19, %v358_v16 }
 0x26c   :  { %v331_v43 = vpop.xlane.xlu1 %330 }
 0x26d   :  { %v332_v44 = vrot.slane %v331_v43, 4  ;;  %v361_v27 = vrot.slane %v360_v24, 1 }
 0x26f   :  { %v333_v45 = vadd.f32 %v332_v44, %v331_v43  ;;  %v362_v34 = vadd.f32 %v361_v27, %v360_v24 }
 0x271   :  { %v334_v46 = vrot.slane %v333_v45, 2 }
 0x273   :  { %v335_v47 = vadd.f32 %v334_v46, %v333_v45 }
 0x275   :  { %v336_v49 = vrot.slane %v335_v47, 1 }
 0x277   :  { %v337_v50 = vadd.f32 %v336_v49, %v335_v47 }
 0x279   :  { %520 = vpush %v337_v50 }
 0x27c   :  { %v434_v54 = vpop.f32.mrf.mxu2 }
 0x27d   :  { %v435_v59 = vadd.f32 %v434_v54, %v381_v55 }
 0x27f   :  { %v440_v4 = vsub.f32 %v435_v59, %v560_v3 }
 0x282   :  { %v319_v58 = vpop.f32.mrf.mxu1 }
 0x283   :  { %v320_v60 = vadd.f32 %v319_v58, %v266_v25 }
 0x285   :  { %v325_v63 = vsub.f32 %v320_v60, %v558_v62 }
 0x287   :  { %561 = vlog2.f32 %v325_v63 }
 0x288   :  { %563 = vlog2.f32 %v440_v4 }
 0x289   :  { %565 = vrcp.f32 %v661_v11 }
 0x28d   :  { %v562_v5 = vpop.eup %561 }
 0x28e   :  { %v340_v7 = vmul.f32 0.6931472, %v562_v5  ;;  %v564_v56 = vpop.eup %563 }
 0x28f   :  { %v454_v57 = vmul.f32 0.6931472, %v564_v56  ;;  %v566_v9 = vpop.eup %565 }
 0x290   :  { %v341_v10 = vsel %vm328_vm1, %v340_v7, 0.0  ;;  %v367_v17 = vmul.f32 16.0, %v566_v9  ;;  %vm371_vm2 = vweird.f32 %v566_v9 }
 0x291   :  { %342 = vadd.xlane.f32.xlu1 %v341_v10  ;;  %v455_v61 = vsel %vm328_vm1, %v454_v57, 0.0 }
 0x292   :  { %v368_v21 = vsub.f32 1.0, %v367_v17 }
 0x294   :  { %v369_v12 = vmul.f32 %v566_v9, %v368_v21 }
 0x296   :  { %v370_v28 = vadd.f32 %v566_v9, %v369_v12 }
 0x298   :  { %v372_v35 = vsel %vm371_vm2, %v566_v9, %v370_v28 }
 0x299   :  { %456 = vadd.xlane.f32.xlu1 %v455_v61 }
 0x2a1   :  { %468 = vadd.xlane.f32.xlu1 %v467_v6 }
 0x2aa   :  { %s521_s6 = spop %520 }
 0x2c4   :  { %v445_v13 = vpop.xlane.xlu1 %444 }
 0x2c5   :  { %v446_v15 = vrot.slane %v445_v13, 4 }
 0x2c7   :  { %v447_v18 = vadd.f32 %v446_v15, %v445_v13 }
 0x2c9   :  { %v448_v1 = vrot.slane %v447_v18, 2 }
 0x2cb   :  { %v449_v0 = vadd.f32 %v448_v1, %v447_v18 }
 0x2cd   :  { %v450_v31 = vrot.slane %v449_v0, 1 }
 0x2cf   :  { %v451_v37 = vadd.f32 %v450_v31, %v449_v0 }
 0x304   :  { %v343_v20 = vpop.xlane.xlu1 %342 }
 0x305   :  { %v344_v22 = vrot.slane %v343_v20, 4 }
 0x307   :  { %v345_v23 = vadd.f32 %v344_v22, %v343_v20 }
 0x309   :  { %v346_v25 = vrot.slane %v345_v23, 2 }
 0x30b   :  { %v347_v2 = vadd.f32 %v346_v25, %v345_v23 }
 0x30c   :  { %v457_v26 = vpop.xlane.xlu1 %456 }
 0x30d   :  { %v458_v29 = vrot.slane %v457_v26, 4  ;;  %v348_v30 = vrot.slane %v347_v2, 1 }
 0x30f   :  { %v459_v32 = vadd.f32 %v458_v29, %v457_v26  ;;  %v349_v33 = vadd.f32 %v348_v30, %v347_v2 }
 0x311   :  { %v460_v36 = vrot.slane %v459_v32, 2  ;;  %522 = vpush %v349_v33 }
 0x312   :  { %524 = vpush %v362_v34 }
 0x313   :  { %526 = vpush %v372_v35  ;;  %v461_v38 = vadd.f32 %v460_v36, %v459_v32 }
 0x314   :  { %528 = vpush %v451_v37  ;;  %v469_v39 = vpop.xlane.xlu1 %468 }
 0x315   :  { %v470_v40 = vrot.slane %v469_v39, 4  ;;  %v462_v41 = vrot.slane %v461_v38, 1 }
 0x317   :  { %v471_v42 = vadd.f32 %v470_v40, %v469_v39  ;;  %v463_v43 = vadd.f32 %v462_v41, %v461_v38 }
 0x319   :  { %v472_v44 = vrot.slane %v471_v42, 2  ;;  %530 = vpush %v463_v43 }
 0x31b   :  { %v473_v45 = vadd.f32 %v472_v44, %v471_v42 }
 0x31d   :  { %v474_v46 = vrot.slane %v473_v45, 1 }
 0x31f   :  { %v475_v47 = vadd.f32 %v474_v46, %v473_v45 }
 0x321   :  { %532 = vpush %v475_v47 }
 0x342   :  { %s523_s7 = spop %522 }
 0x343   :  { %s525_s8 = spop %524  ;;  %s351_s10 = sadd.f32 %s523_s7, %s521_s6 }
 0x344   :  { %s527_s9 = spop %526  ;;  %s364_s16 = smul.f32 2.0, %s525_s8 }
 0x345   :  { %s529_s11 = spop %528  ;;  %s353_s14 = sadd.f32 %s352_s12, %s351_s10 }
 0x347   :  { %s365_s17 = ssub.f32 %s353_s14, %s364_s16 }
 0x349   :  { %s374_s22 = smul.f32 %s527_s9, %s365_s17 }
 0x34a   :  { %s531_s13 = spop %530 }
 0x34b   :  { %s465_s15 = sadd.f32 %s531_s13, %s529_s11 }
 0x34d   :  { %s466_s19 = sadd.f32 %s465_s15, %s352_s12 }
 0x352   :  { %s533_s18 = spop %532 }
 0x353   :  { %s477_s20 = smul.f32 2.0, %s533_s18 }
 0x355   :  { %s478_s21 = ssub.f32 %s466_s19, %s477_s20 }
 0x357   :  { %s487_s25 = smul.f32 %s527_s9, %s478_s21 }
 0x359   :  { %s488_s0 = sadd.f32 %s487_s25, %s374_s22 }
 0x35b   :  { %490 = sst [smem:[#allocation8]] %s488_s0 }
 0x35c   :  { %499 = dma.smem_to_hbm %s662_s2, 16, %s497_s1, [#allocation4]  }
 0x35d   :  { %655 = dma.done.wait [#allocation4], 16  }
 0x35e   :  { %656 = vsyncadd [#allocation4], 4294967280 }
 0x35f   :  { %504 = sfence }
 0x360   :  { %505 = vsyncpa [#allocation3], 1 }
 0x361   :  { %506 = vsyncpa [#allocation6], 1 }
 0x362   :  { %507 = vsyncpa [#allocation4], 1 }

</bundles_post_ra>
